<compile_context>
chip_gen: v7x
topology: tpu7x:2x2x1
jax: 0.10.0
libtpu: 0.0.40
codegen_flags: <defaults>
</compile_context>

<pallas_src>
import jax
import jax.numpy as jnp
from jax.experimental import pallas as pl
from jax.experimental.pallas import tpu as pltpu

_LANE = 128  # classifier output padded to one full lane for a dense store


# ---------------------------------------------------------------------------
# Fused Pallas kernel
# ---------------------------------------------------------------------------
def _blond_resnet_kernel(x_ref, pm_ref, nm_ref,
                         wa_ref, ba_ref, wb_ref, bb_ref, ws_ref, bs_ref,
                         pool_ref, cw_ref, cb_ref, out_ref):
    """Fused BlondResNet(num_layers=1) forward.

    x_ref:   (M, Cin) with M = B*L, channels-last.
    pm_ref:  (M, 1) mask, 0 where a row has no previous position in its batch.
    nm_ref:  (M, 1) mask, 0 where a row has no next position in its batch.
    wa_ref:  (3*Cin, Cout)  first k=3 conv, taps stacked on K, BN folded.
    wb_ref:  (3*Cout, Cout) second k=3 conv, BN folded.
    ws_ref:  (Cin, Cout)    1x1 skip conv, BN folded.
    pool_ref:(B, M)         per-batch mean-over-L matrix (entries 1/L).
    cw_ref:  (Cout, 128)    classifier weight, zero-padded to a full lane.
    cb_ref:  (1, 128)       classifier bias, zero-padded.
    out_ref: (B, 128)
    """
    x = x_ref[...]                                   # (M, Cin)
    M = x.shape[0]
    pm = pm_ref[...]
    nm = nm_ref[...]

    # --- main path: Conv1d(k=3, pad=1) + BN + ReLU --------------------------
    xp = pltpu.roll(x, 1, 0) * pm                    # x[p-1], zero at seq start
    xn = pltpu.roll(x, M - 1, 0) * nm                # x[p+1], zero at seq end
    xc = jnp.concatenate([xp, x, xn], axis=-1)       # (M, 3*Cin)
    h = jnp.dot(xc, wa_ref[...], preferred_element_type=jnp.float32) + ba_ref[...]
    h = jnp.maximum(h, 0.0)

    # --- main path: Conv1d(k=3, pad=1) + BN ---------------------------------
    hp = pltpu.roll(h, 1, 0) * pm
    hn = pltpu.roll(h, M - 1, 0) * nm
    hc = jnp.concatenate([hp, h, hn], axis=-1)       # (M, 3*Cout)
    h2 = jnp.dot(hc, wb_ref[...], preferred_element_type=jnp.float32) + bb_ref[...]

    # --- skip path: Conv1d(k=1) + BN ----------------------------------------
    skip = jnp.dot(x, ws_ref[...], preferred_element_type=jnp.float32) + bs_ref[...]

    # --- residual add + ReLU -------------------------------------------------
    res = jnp.maximum(h2 + skip, 0.0)                # (M, Cout)

    # --- AdaptiveAvgPool1d(1) as a matmul, then Linear head ------------------
    pooled = jnp.dot(pool_ref[...], res, preferred_element_type=jnp.float32)  # (B, Cout)
    out_ref[...] = (jnp.dot(pooled, cw_ref[...], preferred_element_type=jnp.float32)
                    + cb_ref[...])                   # (B, 128) lane-dense store


# ---------------------------------------------------------------------------
# Wrapper: fold eval-mode BN into convs, build masks / pool matrix, call kernel
# ---------------------------------------------------------------------------
def _fold_conv_bn(w, b, bn, eps=1e-5):
    """Fold eval-mode BatchNorm1d into a channels-last conv.

    w: (Cout, Cin, K) PyTorch layout.  Returns ((K*Cin, Cout), (1, Cout)).
    """
    gamma, beta, mean, var = bn
    scale = gamma / jnp.sqrt(var + eps)
    offset = beta - mean * scale
    K = w.shape[2]
    w_cat = jnp.concatenate([w[:, :, k].T for k in range(K)], axis=0)  # (K*Cin, Cout)
    return w_cat * scale[None, :], (b * scale + offset)[None, :]


def blond_resnet_forward(x, params):
    """x: (B, L, Cin) channels-last.  Returns (B, num_classes)."""
    B, L, Cin = x.shape
    p0 = params["layer0"]
    Cout = p0["wa"].shape[0]
    NC = params["cls_w"].shape[0]
    M = B * L

    wa, ba = _fold_conv_bn(p0["wa"], p0["ba"], p0["bna"])
    wb, bb = _fold_conv_bn(p0["wb"], p0["bb"], p0["bnb"])
    ws, bs = _fold_conv_bn(p0["ws"], p0["bs"], p0["bns"])

    rows = jnp.arange(M)
    prev_mask = (rows % L != 0).astype(jnp.float32)[:, None]       # (M, 1)
    next_mask = (rows % L != L - 1).astype(jnp.float32)[:, None]   # (M, 1)
    pool = ((rows[None, :] // L) == jnp.arange(B)[:, None]).astype(jnp.float32) / L  # (B, M)

    cw = jnp.zeros((Cout, _LANE), jnp.float32).at[:, :NC].set(params["cls_w"].T)
    cb = jnp.zeros((1, _LANE), jnp.float32).at[:, :NC].set(params["cls_b"][None, :])

    x_flat = x.reshape(M, Cin)   # merge leading dims only; no relayout

    out_padded = pl.pallas_call(
        _blond_resnet_kernel,
        out_shape=jax.ShapeDtypeStruct((B, _LANE), jnp.float32),
        in_specs=[pl.BlockSpec(memory_space=pltpu.MemorySpace.VMEM)] * 12,
        out_specs=pl.BlockSpec(memory_space=pltpu.MemorySpace.VMEM),
    )(x_flat, prev_mask, next_mask, wa, ba, wb, bb, ws, bs, pool, cw, cb)
    return out_padded[:, :NC]


# ---------------------------------------------------------------------------
# Deterministic parameter construction (PyTorch-layout raw params)
# ---------------------------------------------------------------------------
def _make_bn(key, c):
    k1, k2, k3, k4 = jax.random.split(key, 4)
    gamma = 1.0 + 0.1 * jax.random.normal(k1, (c,), jnp.float32)
    beta = 0.1 * jax.random.normal(k2, (c,), jnp.float32)
    mean = 0.1 * jax.random.normal(k3, (c,), jnp.float32)
    var = jnp.abs(jax.random.normal(k4, (c,), jnp.float32)) + 0.5
    return gamma, beta, mean, var


def _make_conv(key, cout, cin, k):
    k1, k2 = jax.random.split(key)
    w = 0.2 * jax.random.normal(k1, (cout, cin, k), jnp.float32)
    b = 0.05 * jax.random.normal(k2, (cout,), jnp.float32)
    return w, b


def _make_params(key, cin, cout, num_classes):
    ks = jax.random.split(key, 8)
    wa, ba = _make_conv(ks[0], cout, cin, 3)
    wb, bb = _make_conv(ks[1], cout, cout, 3)
    ws, bs = _make_conv(ks[2], cout, cin, 1)
    layer0 = dict(wa=wa, ba=ba, bna=_make_bn(ks[3], cout),
                  wb=wb, bb=bb, bnb=_make_bn(ks[4], cout),
                  ws=ws, bs=bs, bns=_make_bn(ks[5], cout))
    cls_w = 0.2 * jax.random.normal(ks[6], (num_classes, cout), jnp.float32)
    cls_b = 0.05 * jax.random.normal(ks[7], (num_classes,), jnp.float32)
    return dict(layer0=layer0, cls_w=cls_w, cls_b=cls_b)


# ---------------------------------------------------------------------------
# Pure-JAX reference (for correctness check)
# ---------------------------------------------------------------------------
def _bn_eval(x, bn, eps=1e-5):
    gamma, beta, mean, var = bn
    return (x - mean) / jnp.sqrt(var + eps) * gamma + beta


def _conv1d_ref(x, w, b):
    """Channels-last Conv1d, stride 1, 'same' padding, k in {1, 3}."""
    K = w.shape[2]
    taps = [w[:, :, k].T for k in range(K)]                 # each (Cin, Cout)
    if K == 1:
        return jnp.einsum("blc,cd->bld", x, taps[0]) + b
    xp = jnp.pad(x, ((0, 0), (1, 0), (0, 0)))[:, :-1, :]
    xn = jnp.pad(x, ((0, 0), (0, 1), (0, 0)))[:, 1:, :]
    return (jnp.einsum("blc,cd->bld", xp, taps[0])
            + jnp.einsum("blc,cd->bld", x, taps[1])
            + jnp.einsum("blc,cd->bld", xn, taps[2]) + b)


def _ref_forward(x, params):
    p = params["layer0"]
    h = jnp.maximum(_bn_eval(_conv1d_ref(x, p["wa"], p["ba"]), p["bna"]), 0.0)
    h = _bn_eval(_conv1d_ref(h, p["wb"], p["bb"]), p["bnb"])
    s = _bn_eval(_conv1d_ref(x, p["ws"], p["bs"]), p["bns"])
    out = jnp.maximum(h + s, 0.0)
    pooled = jnp.mean(out, axis=1)                          # AdaptiveAvgPool1d(1)
    return pooled @ params["cls_w"].T + params["cls_b"]     # BlondNetMLP (1 Linear)


# ---------------------------------------------------------------------------
if __name__ == "__main__":
    B, L = 2, 16
    in_features, out_features, num_classes = 4, 10, 5

    root = jax.random.PRNGKey(0)
    kx, kp = jax.random.split(root)
    params = _make_params(kp, in_features, out_features, num_classes)

    # PyTorch input would be (B, C, L); kernel layout is channels-last (B, L, C).
    x = jax.random.normal(kx, (B, L, in_features), jnp.float32)

    out = jax.block_until_ready(blond_resnet_forward(x, params))
    ref = jax.block_until_ready(_ref_forward(x, params))

    assert out.shape == (B, num_classes), out.shape
    assert jnp.allclose(out, ref, atol=1e-4, rtol=1e-4), (out, ref)
    print("KERNEL_OK")
</pallas_src>

<mosaic_0001>
module attributes {stable_mosaic.version = 11 : i64} {
  func.func @_blond_resnet_kernel(%arg0: memref<32x4xf32, #tpu.memory_space<vmem>>, %arg1: memref<32x1xf32, #tpu.memory_space<vmem>>, %arg2: memref<32x1xf32, #tpu.memory_space<vmem>>, %arg3: memref<12x10xf32, #tpu.memory_space<vmem>>, %arg4: memref<1x10xf32, #tpu.memory_space<vmem>>, %arg5: memref<30x10xf32, #tpu.memory_space<vmem>>, %arg6: memref<1x10xf32, #tpu.memory_space<vmem>>, %arg7: memref<4x10xf32, #tpu.memory_space<vmem>>, %arg8: memref<1x10xf32, #tpu.memory_space<vmem>>, %arg9: memref<2x32xf32, #tpu.memory_space<vmem>>, %arg10: memref<10x128xf32, #tpu.memory_space<vmem>>, %arg11: memref<1x128xf32, #tpu.memory_space<vmem>>, %arg12: memref<2x128xf32, #tpu.memory_space<vmem>>) attributes {dimension_semantics = [], scalar_prefetch = 0 : i64, scratch_operands = 0 : i64, tpu.core_type = #tpu.core_type<tc>} {
    %c0 = arith.constant 0 : index
    %c0_0 = arith.constant 0 : index
    %0 = vector.load %arg0[%c0, %c0_0] : memref<32x4xf32, #tpu.memory_space<vmem>>, vector<32x4xf32>
    %c0_1 = arith.constant 0 : index
    %c0_2 = arith.constant 0 : index
    %1 = vector.load %arg1[%c0_1, %c0_2] : memref<32x1xf32, #tpu.memory_space<vmem>>, vector<32x1xf32>
    %c0_3 = arith.constant 0 : index
    %c0_4 = arith.constant 0 : index
    %2 = vector.load %arg2[%c0_3, %c0_4] : memref<32x1xf32, #tpu.memory_space<vmem>>, vector<32x1xf32>
    %c1_i32 = arith.constant 1 : i32
    %3 = tpu.dynamic_rotate %0 by %c1_i32 dim 0 : vector<32x4xf32>, i32 -> vector<32x4xf32>
    %4 = vector.broadcast %1 : vector<32x1xf32> to vector<32x4xf32>
    %5 = arith.mulf %3, %4 : vector<32x4xf32>
    %c31_i32 = arith.constant 31 : i32
    %6 = tpu.dynamic_rotate %0 by %c31_i32 dim 0 : vector<32x4xf32>, i32 -> vector<32x4xf32>
    %7 = vector.broadcast %2 : vector<32x1xf32> to vector<32x4xf32>
    %8 = arith.mulf %6, %7 : vector<32x4xf32>
    %9 = tpu.concatenate %5, %0, %8 in 1 : vector<32x4xf32>, vector<32x4xf32>, vector<32x4xf32> -> vector<32x12xf32>
    %c0_5 = arith.constant 0 : index
    %c0_6 = arith.constant 0 : index
    %10 = vector.load %arg3[%c0_5, %c0_6] : memref<12x10xf32, #tpu.memory_space<vmem>>, vector<12x10xf32>
    %cst = arith.constant dense<0.000000e+00> : vector<32x10xf32>
    %11 = tpu.matmul %9, %10, %cst {dimension_numbers = #tpu.dot_dimension_numbers<[1], [0], [0], [1], [0, 0, 1, 1], [], []>} : vector<32x12xf32>, vector<12x10xf32>, vector<32x10xf32> -> vector<32x10xf32>
    %c0_7 = arith.constant 0 : index
    %c0_8 = arith.constant 0 : index
    %12 = vector.load %arg4[%c0_7, %c0_8] : memref<1x10xf32, #tpu.memory_space<vmem>>, vector<1x10xf32>
    %13 = vector.broadcast %12 : vector<1x10xf32> to vector<32x10xf32>
    %14 = arith.addf %11, %13 : vector<32x10xf32>
    %cst_9 = arith.constant 0.000000e+00 : f32
    %15 = vector.broadcast %cst_9 : f32 to vector<32x10xf32>
    %16 = arith.maximumf %14, %15 : vector<32x10xf32>
    %c1_i32_10 = arith.constant 1 : i32
    %17 = tpu.dynamic_rotate %16 by %c1_i32_10 dim 0 : vector<32x10xf32>, i32 -> vector<32x10xf32>
    %18 = vector.broadcast %1 : vector<32x1xf32> to vector<32x10xf32>
    %19 = arith.mulf %17, %18 : vector<32x10xf32>
    %c31_i32_11 = arith.constant 31 : i32
    %20 = tpu.dynamic_rotate %16 by %c31_i32_11 dim 0 : vector<32x10xf32>, i32 -> vector<32x10xf32>
    %21 = vector.broadcast %2 : vector<32x1xf32> to vector<32x10xf32>
    %22 = arith.mulf %20, %21 : vector<32x10xf32>
    %23 = tpu.concatenate %19, %16, %22 in 1 : vector<32x10xf32>, vector<32x10xf32>, vector<32x10xf32> -> vector<32x30xf32>
    %c0_12 = arith.constant 0 : index
    %c0_13 = arith.constant 0 : index
    %24 = vector.load %arg5[%c0_12, %c0_13] : memref<30x10xf32, #tpu.memory_space<vmem>>, vector<30x10xf32>
    %cst_14 = arith.constant dense<0.000000e+00> : vector<32x10xf32>
    %25 = tpu.matmul %23, %24, %cst_14 {dimension_numbers = #tpu.dot_dimension_numbers<[1], [0], [0], [1], [0, 0, 1, 1], [], []>} : vector<32x30xf32>, vector<30x10xf32>, vector<32x10xf32> -> vector<32x10xf32>
    %c0_15 = arith.constant 0 : index
    %c0_16 = arith.constant 0 : index
    %26 = vector.load %arg6[%c0_15, %c0_16] : memref<1x10xf32, #tpu.memory_space<vmem>>, vector<1x10xf32>
    %27 = vector.broadcast %26 : vector<1x10xf32> to vector<32x10xf32>
    %28 = arith.addf %25, %27 : vector<32x10xf32>
    %c0_17 = arith.constant 0 : index
    %c0_18 = arith.constant 0 : index
    %29 = vector.load %arg7[%c0_17, %c0_18] : memref<4x10xf32, #tpu.memory_space<vmem>>, vector<4x10xf32>
    %cst_19 = arith.constant dense<0.000000e+00> : vector<32x10xf32>
    %30 = tpu.matmul %0, %29, %cst_19 {dimension_numbers = #tpu.dot_dimension_numbers<[1], [0], [0], [1], [0, 0, 1, 1], [], []>} : vector<32x4xf32>, vector<4x10xf32>, vector<32x10xf32> -> vector<32x10xf32>
    %c0_20 = arith.constant 0 : index
    %c0_21 = arith.constant 0 : index
    %31 = vector.load %arg8[%c0_20, %c0_21] : memref<1x10xf32, #tpu.memory_space<vmem>>, vector<1x10xf32>
    %32 = vector.broadcast %31 : vector<1x10xf32> to vector<32x10xf32>
    %33 = arith.addf %30, %32 : vector<32x10xf32>
    %34 = arith.addf %28, %33 : vector<32x10xf32>
    %cst_22 = arith.constant 0.000000e+00 : f32
    %35 = vector.broadcast %cst_22 : f32 to vector<32x10xf32>
    %36 = arith.maximumf %34, %35 : vector<32x10xf32>
    %c0_23 = arith.constant 0 : index
    %c0_24 = arith.constant 0 : index
    %37 = vector.load %arg9[%c0_23, %c0_24] : memref<2x32xf32, #tpu.memory_space<vmem>>, vector<2x32xf32>
    %cst_25 = arith.constant dense<0.000000e+00> : vector<2x10xf32>
    %38 = tpu.matmul %37, %36, %cst_25 {dimension_numbers = #tpu.dot_dimension_numbers<[1], [0], [0], [1], [0, 0, 1, 1], [], []>} : vector<2x32xf32>, vector<32x10xf32>, vector<2x10xf32> -> vector<2x10xf32>
    %c0_26 = arith.constant 0 : index
    %c0_27 = arith.constant 0 : index
    %39 = vector.load %arg10[%c0_26, %c0_27] : memref<10x128xf32, #tpu.memory_space<vmem>>, vector<10x128xf32>
    %cst_28 = arith.constant dense<0.000000e+00> : vector<2x128xf32>
    %40 = tpu.matmul %38, %39, %cst_28 {dimension_numbers = #tpu.dot_dimension_numbers<[1], [0], [0], [1], [0, 0, 1, 1], [], []>} : vector<2x10xf32>, vector<10x128xf32>, vector<2x128xf32> -> vector<2x128xf32>
    %c0_29 = arith.constant 0 : index
    %c0_30 = arith.constant 0 : index
    %41 = vector.load %arg11[%c0_29, %c0_30] : memref<1x128xf32, #tpu.memory_space<vmem>>, vector<1x128xf32>
    %42 = vector.broadcast %41 : vector<1x128xf32> to vector<2x128xf32>
    %43 = arith.addf %40, %42 : vector<2x128xf32>
    %c0_31 = arith.constant 0 : index
    %c0_32 = arith.constant 0 : index
    %44 = vector.load %arg12[%c0_31, %c0_32] : memref<2x128xf32, #tpu.memory_space<vmem>>, vector<2x128xf32>
    tpu.vector_store %arg12[%c0_31, %c0_32], %43 {strides = array<i32>} : memref<2x128xf32, #tpu.memory_space<vmem>>, vector<2x128xf32>,
    return
  }
}

</mosaic_0001>

<bundles_post_ra>
// kernel: tpu_custom_call.1
= control target key start
LH: loop header
LB: loop body
LE: loop exit
PB: predicated region body
PF: predicated region fallthrough
CT: control target
= control target key end

     0   :  { %v919_v2 = vmov 0   ;;  %s1213_s0 = inlined_call_operand.vmem [shape: f32[32,4], index: 0, kind: input, shape index: {}]   ;;  %s1214_s1 = inlined_call_operand.vmem [shape: f32[32,1], index: 1, kind: input, shape index: {}]   ;;  %s1215_s2 = inlined_call_operand.vmem [shape: f32[32,1], index: 2, kind: input, shape index: {}]   ;;  %s1216_s3 = inlined_call_operand.vmem [shape: f32[12,10], index: 3, kind: input, shape index: {}]   ;;  %s1217_s4 = inlined_call_operand.vmem [shape: f32[1,10], index: 4, kind: input, shape index: {}]   ;;  %s1218_s5 = inlined_call_operand.vmem [shape: f32[30,10], index: 5, kind: input, shape index: {}]   ;;  %s1219_s6 = inlined_call_operand.vmem [shape: f32[1,10], index: 6, kind: input, shape index: {}]   ;;  %s1220_s7 = inlined_call_operand.vmem [shape: f32[4,10], index: 7, kind: input, shape index: {}]   ;;  %s1221_s8 = inlined_call_operand.vmem [shape: f32[1,10], index: 8, kind: input, shape index: {}]   ;;  %s1222_s9 = inlined_call_operand.vmem [shape: f32[2,32], index: 9, kind: input, shape index: {}]   ;;  %s1223_s10 = inlined_call_operand.vmem [shape: f32[10,128], index: 10, kind: input, shape index: {}]   ;;  %s1224_s11 = inlined_call_operand.vmem [shape: f32[1,128], index: 11, kind: input, shape index: {}]   ;;  %s1225_s12 = inlined_call_operand.hbm [shape: f32[2,128], index: 12, kind: output, shape index: {}]  }
   0x1   :  { %v52_v0 = vld [vmem:[%s1215_s2 + $0x10] sm:$0xff]  ;;  %v50_v1 = vld [vmem:[%s1215_s2] sm:$0xff]  ;;  %894 = vset.pattern.permute.xlu1 %v919_v2  ;;  %893 = vset.pattern.permute.xlu0 %v919_v2  ;;  %v53_v3 = vld [vmem:[%s1215_s2 + $0x18] sm:$0xff] }
   0x2   :  { %110 = vperm.xlu1 %894, %v52_v0   ;;  %100 = vperm.xlu0 %893, %v50_v1   ;;  %v51_v4 = vld [vmem:[%s1215_s2 + $0x8] sm:$0xff] }
   0x3   :  { %17 = vsyncpa [#allocation3], 0  ;;  %v47_v5 = vld [vmem:[%s1214_s1 + $0x8] sm:$0xff]  ;;  %v46_v6 = vld [vmem:[%s1214_s1] sm:$0xff]  ;;  %s920_s22 = smov 4   ;;  %v58_v13 = vlaneseq  ;;  %vm186_vm0 = vcmask 1043456  }
   0x4   :  { %v49_v7 = vld [vmem:[%s1214_s1 + $0x18] sm:$0xff]  ;;  %v48_v8 = vld [vmem:[%s1214_s1 + $0x10] sm:$0xff]  ;;  %v1021_v9 = vld [vmem:[%s1213_s0 + $0x8] sm:$0xff]  ;;  %vm921_vm1 = vmmov 1   ;;  %vm154_vm5 = vcmask 31744   ;;  %vm159_vm6 = vcmask 64512  }
   0x5   :  { %v1026_v10 = vld [vmem:[%s1213_s0] sm:$0xff]  ;;  %v1033_v11 = vld [vmem:[%s1213_s0 + $0x18] sm:$0xff]  ;;  %v1038_v12 = vld [vmem:[%s1213_s0 + $0x10] sm:$0xff]  ;;  %v1050_v17 = vshrl.u32 %v58_v13, 7  ;;  %v90_v19 = vrot.slane %v1021_v9, 1  ;;  %s922_s0 = smov 8  }
   0x6   :  { %115 = vperm.xlu1 %894, %v53_v3   ;;  %105 = vperm.xlu0 %893, %v51_v4   ;;  %v164_v14 = vld [vmem:[%s1216_s3] sm:$0xff]  ;;  %v165_v15 = vld [vmem:[%s1216_s3 + $0x8] sm:$0xf]  ;;  %vm846_vm2 = vmpackc.low %vm186_vm0, %vm921_vm1  ;;  %v89_v18 = vrot.slane %v1026_v10, 1  ;;  %v91_v20 = vrot.slane %v1038_v12, 1  ;;  %v92_v21 = vrot.slane %v1033_v11, 1 }
   0x7   :  { %v845_v16 = vpack.c.bf16 %v165_v15, %v164_v14  ;;  %vm93_vm3 = vcmp.lt.s32.totalorder %v1050_v17, 7  ;;  %v54_v39 = vrot.slane %v1026_v10, 7  ;;  %v57_v40 = vrot.slane %v1033_v11, 7  ;;  %v345_v2 = vld [vmem:[%s1218_s5] sm:$0xff]  ;;  %v346_v3 = vld [vmem:[%s1218_s5 + $0x8] sm:$0xff]  ;;  %s928_s29 = smov [#allocation2]  }
   0x8   :  { %v96_v22 = vsel %vm93_vm3, %v89_v18, %v90_v19  ;;  %v94_v24 = vsel %vm93_vm3, %v91_v20, %v92_v21  ;;  %v95_v27 = vsel %vm93_vm3, %v90_v19, %v91_v20  ;;  %v97_v32 = vsel %vm93_vm3, %v92_v21, %v89_v18  ;;  %v458_v19 = vld [vmem:[%s1220_s7] sm:$0xf] }
   0x9   :  { %847 = vmatprep.subr.msk.bf16.mxu0 %vm846_vm2, %v845_v16  ;;  %vm60_vm4 = vcmp.lt.s32.totalorder %v1050_v17, 1  ;;  %v55_v42 = vrot.slane %v1021_v9, 7  ;;  %v56_v44 = vrot.slane %v1038_v12, 7  ;;  %vm173_vm7 = vcmask 97280  }
   0xa   :  { %72 = vperm.xlu1 %894, %v47_v5   ;;  %67 = vperm.xlu0 %893, %v46_v6   ;;  %v64_v43 = vsel %vm60_vm4, %v57_v40, %v54_v39  ;;  %v851_v4 = vpack.c.bf16 %v346_v3, %v345_v2  ;;  %v347_v5 = vld [vmem:[%s1218_s5 + $0x10] sm:$0xff]  ;;  %v348_v6 = vld [vmem:[%s1218_s5 + $0x18] sm:$0x3f]  ;;  %vm369_vm8 = vcmask 1045504   ;;  %s924_s5 = smov 20   ;;  %vm335_vm10 = vcmask 80896  }
   0xb   :  { %850 = vmatpush3.bf16.msk.msra.mxu0 %vm846_vm2, %v845_v16  ;;  %v63_v47 = vsel %vm60_vm4, %v54_v39, %v55_v42  ;;  %v62_v48 = vsel %vm60_vm4, %v55_v42, %v56_v44  ;;  %v61_v55 = vsel %vm60_vm4, %v56_v44, %v57_v40  ;;  %vm856_vm9 = vmpackc.low %vm369_vm8, %vm921_vm1  ;;  %vm340_vm11 = vcmask 162816  }
   0xc   :  { %852 = vmatprep.subr.bf16.mxu1 %v851_v4  ;;  %vm356_vm12 = vcmask 244736   ;;  %vm926_vm13 = vmmov 0   ;;  %v927_v3 = vmov 0.0   ;;  %vm657_vm14 = vcmask 1041408  }
   0xd   :  { %854 = vmatpush3.bf16.msra.mxu1 %v851_v4  ;;  %v752_v4 = vld [vmem:[%s1219_s6] ss:$0 sm:$0xff]  ;;  %vm571_vm15 = vcmask 261120  }
   0xe   :  { %82 = vperm.xlu1 %894, %v49_v7   ;;  %77 = vperm.xlu0 %893, %v48_v8   ;;  %v746_v7 = vld [vmem:[%s1217_s4] ss:$0 sm:$0xff]  ;;  %v855_v8 = vpack.c.bf16 %v348_v6, %v347_v5  ;;  %s923_s4 = smov 10  }
  0x10   :  { %857 = vmatprep.subr.msk.bf16.mxu1 %vm856_vm9, %v855_v8 }
  0x11   :  { %860 = vmatpush3.bf16.msk.msra.mxu1 %vm856_vm9, %v855_v8 }
  0x12   :  { %128 = vrot.lane.b32.xlu1 %v1021_v9, %s920_s22  ;;  %126 = vrot.lane.b32.xlu0 %v1026_v10, %s920_s22 }
  0x13   :  { %819 = vmatprep.subr.msk.mxu1 %vm186_vm0, %v458_v19 }
  0x16   :  { %132 = vrot.lane.b32.xlu1 %v1033_v11, %s920_s22  ;;  %130 = vrot.lane.b32.xlu0 %v1038_v12, %s920_s22 }
  0x81   :  { %v1059_v23 = vpop.permute.xlu1 %110  ;;  %v1063_v25 = vpop.permute.xlu0 %100 }
  0x82   :  { %v118_v26 = vmul.f32 %v1063_v25, %v96_v22  ;;  %v120_v28 = vmul.f32 %v1059_v23, %v94_v24 }
  0x84   :  { %142 = vrot.lane.b32.xlu0 %v118_v26, %s922_s0 }
  0x85   :  { %v1069_v29 = vpop.permute.xlu0 %105  ;;  %v1072_v31 = vpop.permute.xlu1 %115 }
  0x86   :  { %v119_v30 = vmul.f32 %v1069_v29, %v95_v27  ;;  %v121_v33 = vmul.f32 %v1072_v31, %v97_v32 }
  0x88   :  { %144 = vrot.lane.b32.xlu1 %v119_v30, %s922_s0  ;;  %146 = vrot.lane.b32.xlu0 %v120_v28, %s922_s0 }
  0x89   :  { %v1077_v34 = vpop.permute.xlu0 %67  ;;  %v1079_v35 = vpop.permute.xlu1 %72 }
  0x8a   :  { %v85_v46 = vmul.f32 %v1077_v34, %v64_v43  ;;  %v86_v53 = vmul.f32 %v1079_v35, %v63_v47 }
  0x8c   :  { %148 = vrot.lane.b32.xlu1 %v121_v33, %s922_s0  ;;  %s738_s0 = sshll.u32 %s928_s29, 4  ;;  %s739_s0 = int_to_ptr.vmem [resolvable:$true] %s738_s0 }
  0x8d   :  { %v1081_v36 = vpop.permute.xlu0 %77  ;;  %v1083_v37 = vpop.permute.xlu1 %82  ;;  %p900_p1 = scmp.lt.s32.totalorder %s739_s0, %s739_s0 }
  0x8e   :  { %v87_v54 = vmul.f32 %v1081_v36, %v62_v48  ;;  %v88_v62 = vmul.f32 %v1083_v37, %v61_v55 }
  0x91   :  { %v127_v38 = vpop.permute.xlu0 %126  ;;  %v129_v41 = vpop.permute.xlu1 %128 }
  0x92   :  { %v155_v49 = vsel %vm154_vm5, %v85_v46, %v127_v38  ;;  %v156_v56 = vsel %vm154_vm5, %v86_v53, %v129_v41 }
  0x95   :  { %v131_v45 = vpop.permute.xlu0 %130  ;;  %v133_v50 = vpop.permute.xlu1 %132 }
  0x96   :  { %v157_v57 = vsel %vm154_vm5, %v87_v54, %v131_v45  ;;  %v158_v63 = vsel %vm154_vm5, %v88_v62, %v133_v50 }
  0xf6   :  { %v143_v51 = vpop.permute.xlu0 %142 }
  0xf7   :  { %v160_v52 = vsel %vm159_vm6, %v155_v49, %v143_v51 }
  0xf8   :  { %799 = vmatprep.mubr.msk.f32.mxu0 %vm173_vm7, %v160_v52 }
  0xfa   :  { %v145_v58 = vpop.permute.xlu1 %144  ;;  %v147_v59 = vpop.permute.xlu0 %146 }
  0xfb   :  { %v161_v60 = vsel %vm159_vm6, %v156_v56, %v145_v58  ;;  %v162_v61 = vsel %vm159_vm6, %v157_v57, %v147_v59 }
  0xfc   :  { %800 = vmatmul.mubr.msk.f32.vlgmr.msra.gmra.mrb[0].mxu0 %vm173_vm7, %v161_v60 }
  0xfd   :  { %802 = vmatprep.mubr.msk.f32.mxu0 %vm173_vm7, %v162_v61 }
  0xfe   :  { %v149_v0 = vpop.permute.xlu1 %148 }
  0xff   :  { %v163_v1 = vsel %vm159_vm6, %v158_v63, %v149_v0 }
 0x100   :  { %803 = vmatmul.mubr.msk.f32.gmra.mrb[2].mxu0 %vm173_vm7, %v163_v1 }
 0x101   :  { %835 = vmatprep.mubr.msk.f32.mxu0 %vm926_vm13, %v927_v3 }
 0x1cf   :  { %v801_v13 = vpop.f32.mrb[0].mxu0 }
 0x1d0   :  { %v262_v14 = vadd.f32 %v801_v13, %v746_v7  ;;  %v256_v15 = vpop.f32.mrb[1].mxu0 }
 0x1d1   :  { %v257_v16 = vadd.f32 %v746_v7, %v256_v15 }
 0x1d2   :  { %v276_v18 = vmax.f32 %v262_v14, 0.0 }
 0x1d3   :  { %v275_v20 = vmax.f32 %v257_v16, 0.0  ;;  %v804_v21 = vpop.f32.mrb[2].mxu0 }
 0x1d4   :  { %v280_v22 = vrot.slane %v276_v18, 7  ;;  %v292_v24 = vrot.slane %v276_v18, 1  ;;  %v272_v26 = vadd.f32 %v804_v21, %v746_v7  ;;  %309 = vrot.lane.b32.xlu1 %v276_v18, %s923_s4  ;;  %v266_v27 = vpop.f32.mrb[3].mxu0 }
 0x1d5   :  { %v279_v28 = vrot.slane %v275_v20, 7  ;;  %v291_v30 = vrot.slane %v275_v20, 1  ;;  %v267_v32 = vadd.f32 %v746_v7, %v266_v27  ;;  %307 = vrot.lane.b32.xlu0 %v275_v20, %s923_s4  ;;  %v646_v27 = vld [vmem:[%s1223_s10 + $0x8] sm:$0x3] }
 0x1d6   :  { %v278_v33 = vmax.f32 %v272_v26, 0.0  ;;  %v645_v26 = vld [vmem:[%s1223_s10] sm:$0xff] }
 0x1d7   :  { %v277_v38 = vmax.f32 %v267_v32, 0.0  ;;  %v297_v39 = vsel %vm93_vm3, %v291_v30, %v292_v24  ;;  %v285_v40 = vsel %vm60_vm4, %v279_v28, %v280_v22 }
 0x1d8   :  { %v282_v41 = vrot.slane %v278_v33, 7  ;;  %v294_v42 = vrot.slane %v278_v33, 1  ;;  %313 = vrot.lane.b32.xlu1 %v278_v33, %s923_s4  ;;  %v299_v47 = vmul.f32 %v297_v39, %v1063_v25  ;;  %v288_v17 = vmul.f32 %v285_v40, %v1079_v35 }
 0x1d9   :  { %v281_v43 = vrot.slane %v277_v38, 7  ;;  %v293_v44 = vrot.slane %v277_v38, 1  ;;  %311 = vrot.lane.b32.xlu0 %v277_v38, %s923_s4  ;;  %v765_v38 = vld [vmem:[%s1224_s11] ss:$0 sm:$0xff] }
 0x1da   :  { %v298_v45 = vsel %vm93_vm3, %v294_v42, %v291_v30  ;;  %v286_v46 = vsel %vm60_vm4, %v282_v41, %v279_v28  ;;  %v570_v28 = vld [vmem:[%s1222_s9] sm:$0x3]  ;;  %v868_v30 = vpack.c.bf16 %v646_v27, %v645_v26  ;;  %s895_s9 = scalar_lea.vmem %s739_s0, 32 }
 0x1db   :  { %v296_v48 = vsel %vm93_vm3, %v292_v24, %v293_v44  ;;  %v295_v49 = vsel %vm93_vm3, %v293_v44, %v294_v42  ;;  %v283_v51 = vsel %vm60_vm4, %v281_v43, %v282_v41  ;;  %v284_v52 = vsel %vm60_vm4, %v280_v22, %v281_v43  ;;  %p896_p0 = scmp.ne.s32.totalorder %s739_s0, %s895_s9  ;;  %p901_p2 = scmp.lt.s32.totalorder %s895_s9, %s895_s9 }
 0x1dc   :  { %v300_v50 = vmul.f32 %v296_v48, %v1069_v29  ;;  %v301_v53 = vmul.f32 %v295_v49, %v1059_v23  ;;  %v302_v25 = vmul.f32 %v298_v45, %v1072_v31  ;;  %v287_v57 = vmul.f32 %v286_v46, %v1077_v34 }
 0x1dd   :  { %323 = vrot.lane.b32.xlu0 %v299_v47, %s924_s5  ;;  %v289_v61 = vmul.f32 %v284_v52, %v1081_v36  ;;  %v290_v34 = vmul.f32 %v283_v51, %v1083_v37  ;;  %v925_v37 = vmov 0.0|0.0   ;;  %p902_p3 = por %p901_p2, %p900_p1 }
 0x1de   :  { %325 = vrot.lane.b32.xlu1 %v300_v50, %s924_s5  ;;  %861 = vmatprep.subr.bf16.mxu0 %v925_v37 }
 0x1df   :  { %p903_p4 = pnand %p902_p3, %p896_p0 }
 0x1e1   :  { %327 = vrot.lane.b32.xlu0 %v301_v53, %s924_s5 }
 0x1e2   :  { %329 = vrot.lane.b32.xlu1 %v302_v25, %s924_s5 }
 0x246   :  { %v310_v54 = vpop.permute.xlu1 %309 }
 0x247   :  { %v308_v55 = vpop.permute.xlu0 %307  ;;  %v337_v23 = vsel %vm335_vm10, %v288_v17, %v310_v54 }
 0x248   :  { %v336_v58 = vsel %vm335_vm10, %v287_v57, %v308_v55 }
 0x24a   :  { %v314_v29 = vpop.permute.xlu1 %313 }
 0x24b   :  { %v312_v56 = vpop.permute.xlu0 %311  ;;  %v339_v0 = vsel %vm335_vm10, %v290_v34, %v314_v29 }
 0x24c   :  { %v338_v35 = vsel %vm335_vm10, %v289_v61, %v312_v56 }
 0x24f   :  { %v324_v59 = vpop.permute.xlu0 %323 }
 0x250   :  { %v326_v60 = vpop.permute.xlu1 %325  ;;  %v341_v31 = vsel %vm340_vm11, %v336_v58, %v324_v59 }
 0x251   :  { %v342_v62 = vsel %vm340_vm11, %v337_v23, %v326_v60  ;;  %813 = vmatprep.mubr.msk.f32.mxu1 %vm356_vm12, %v341_v31 }
 0x252   :  { %814 = vmatmul.mubr.msk.f32.vlgmr.msra.gmra.mrb[0].mxu1 %vm356_vm12, %v342_v62 }
 0x253   :  { %v328_v63 = vpop.permute.xlu0 %327  ;;  %820 = vmatpush3.msk.msra.mxu1 %vm186_vm0, %v458_v19  ;;  %vm869_vm0 = vmpackc.low %vm657_vm14, %vm921_vm1 }
 0x254   :  { %v343_v1 = vsel %vm340_vm11, %v338_v35, %v328_v63  ;;  %v330_v2 = vpop.permute.xlu1 %329 }
 0x255   :  { %v344_v36 = vsel %vm340_vm11, %v339_v0, %v330_v2  ;;  %816 = vmatprep.mubr.msk.f32.mxu1 %vm356_vm12, %v343_v1 }
 0x256   :  { %817 = vmatmul.mubr.msk.f32.gmra.mrb[2].mxu1 %vm356_vm12, %v344_v36 }
 0x257   :  { %821 = vmatprep.mubr.msk.f32.mxu1 %vm154_vm5, %v1026_v10 }
 0x25a   :  { %822 = vmatmul.mubr.msk.f32.vlgmr.msra.gmra.mrb[0].mxu1 %vm154_vm5, %v1021_v9  ;;  %v758_v9 = vld [vmem:[%s1221_s8] ss:$0 sm:$0xff] }
 0x25b   :  { %824 = vmatprep.mubr.msk.f32.mxu1 %vm154_vm5, %v1038_v12  ;;  %v877_v6 = vadd.f32 %v758_v9, %v752_v4 }
 0x25e   :  { %825 = vmatmul.mubr.msk.f32.gmra.mrb[2].mxu1 %vm154_vm5, %v1033_v11 }
 0x32d   :  { %v823_v10 = vpop.f32.mrb[0].mxu1 }
 0x32e   :  { %v871_v5 = vadd.f32 %v823_v10, %v752_v4  ;;  %v543_v12 = vpop.f32.mrb[1].mxu1 }
 0x32f   :  { %v873_v7 = vadd.f32 %v752_v4, %v543_v12 }
 0x330   :  { %v872_v11 = vadd.f32 %v871_v5, %v758_v9 }
 0x331   :  { %v874_v8 = vadd.f32 %v873_v7, %v758_v9  ;;  %v826_v13 = vpop.f32.mrb[2].mxu1 }
 0x332   :  { %v567_v14 = vmax.f32 %v872_v11, 0.0  ;;  %v876_v15 = vadd.f32 %v877_v6, %v826_v13  ;;  %v553_v16 = vpop.f32.mrb[3].mxu1 }
 0x333   :  { %v566_v18 = vmax.f32 %v874_v8, 0.0  ;;  %v878_v19 = vadd.f32 %v877_v6, %v553_v16 }
 0x334   :  { %v569_v20 = vmax.f32 %v876_v15, 0.0 }
 0x335   :  { %v862_v21 = vpack.c.bf16 %v567_v14, %v566_v18  ;;  %v568_v22 = vmax.f32 %v878_v19, 0.0 }
 0x337   :  { %v865_v24 = vpack.c.bf16 %v569_v20, %v568_v22  ;;  %863 = vmatpush3.bf16.msra.mxu0 %v862_v21 }
 0x338   :  { %864 = vmatprep.subr.bf16.mxu0 %v925_v37 }
 0x33b   :  { %866 = vmatpush3.bf16.msra.mxu0 %v865_v24 }
 0x33c   :  { %867 = vmatprep.subr.bf16.mxu0 %v925_v37 }
 0x33e   :  { %836 = vmatmul.mubr.msk.f32.vlgmr.msra.gmra.mrb[4].mxu0 %vm571_vm15, %v570_v28 }
 0x33f   :  { %870 = vmatpush3.bf16.msk.msra.mxu0 %vm869_vm0, %v868_v30  ;;  %842 = vmatprep.mubr.msk.f32.mxu0 %vm926_vm13, %v927_v3 }
 0x411   :  { %v641_v32 = vpop.f32.mrb[4].mxu0 }
 0x412   :  { %v837_v33 = vpop.f32.mrb[5].mxu0  ;;  %843 = vmatmul.mubr.msk.f32.vlgmr.msra.gmra.mrb[6].mxu0 %vm335_vm10, %v641_v32 }
 0x4e5   :  { %v727_v39 = vpop.f32.mrb[6].mxu0 }
 0x4e6   :  { %v728_v40 = vadd.f32 %v765_v38, %v727_v39  ;;  %v844_v41 = vpop.f32.mrb[7].mxu0 }
 0x4e8   :  { %731 = vst [vmem:[#allocation2] sm:$0x3] %v728_v40 }
 0x4e9   :  { %906 = shalt.err (!%p903_p4)
}
 0x4ea   :  { %s907_s13 = scalar_lea.hbm %s1225_s12, 32 }
 0x4eb   :  { %p908_p5 = scmp.ne.s32.totalorder %s1225_s12, %s907_s13  ;;  %p911_p6 = scmp.lt.u32.totalorder %s907_s13, %s1225_s12 }
 0x4ed   :  { %p913_p7 = pnand %p911_p6, %p908_p5 }
 0x4ef   :  { %916 = shalt.err (!%p913_p7)
}
 0x4f0   :  { %741 = dma.vmem_to_hbm [thread:$0]  %s739_s0, 32, %s1225_s12, [#allocation3]  }
 0x4f1   :  { %917 = dma.done.wait [#allocation3], 32  }
 0x4f2   :  { %918 = vsyncadd [#allocation3], 4294967264 }
 0x4f3   :  { %745 = vsyncpa [#allocation3], 1 }

</bundles_post_ra>
